<compile_context>
chip_gen: v6e
topology: v6e:2x2x1
jax: 0.10.0
libtpu: 0.0.40
codegen_flags: <defaults>
</compile_context>

<pallas_src>
import jax
import jax.numpy as jnp
from jax.experimental import pallas as pl
from jax.experimental.pallas import tpu as pltpu


def _masked_rnn_kernel(len_ref, xp_ref, whh_ref, out_ref, hx_ref, h_sc):
    """One grid step == one (batch block, time block).

    len_ref: (TB, 1)  int32 sequence lengths for this batch block
    xp_ref : (TT, TB, Hp)  pre-activations x@W_ih^T + b for this time block
    whh_ref: (Hp, Hp)      W_hh^T, whole array resident in VMEM
    out_ref: (TT, TB, Hp)  outputs for this time block (zeros where masked)
    hx_ref : (1, TB, Hp)   final hidden state (resident across time blocks)
    h_sc   : (TB, Hp)      f32 VMEM scratch carrying h across time blocks
    """
    t_blk = pl.program_id(1)

    @pl.when(t_blk == 0)
    def _():
        h_sc[...] = jnp.zeros_like(h_sc)

    lengths = len_ref[...]                       # (TB, 1) int32
    tt_steps = out_ref.shape[0]                  # static TT
    t0 = t_blk * tt_steps

    h = h_sc[...]                                # (TB, Hp) float32 carry
    for tt in range(tt_steps):                   # fully unrolled inner loop
        pre = (xp_ref[tt].astype(jnp.float32)
               + jnp.dot(h.astype(whh_ref.dtype), whh_ref[...],
                         preferred_element_type=jnp.float32))
        h_new = jnp.tanh(pre)
        m = (t0 + tt) < lengths                  # (TB, 1) bool, t < length[b]
        out_ref[tt] = jnp.where(m, h_new, 0.0).astype(out_ref.dtype)
        h = jnp.where(m, h_new, h)               # freeze state past length
    h_sc[...] = h

    @pl.when(t_blk == pl.num_programs(1) - 1)
    def _():
        hx_ref[0] = h.astype(hx_ref.dtype)       # last valid hidden state


def masked_rnn_forward(inputs, mask, w_ih, w_hh, b_ih, b_hh,
                       *, time_block=16, batch_block=None,
                       compute_dtype=jnp.float32):
    """Equivalent of _MaskedBase(nn.RNN(D, H, batch_first=True)).forward.

    inputs: [B, T, D] float32 (batch_first), mask: [B, T] bool (left-contiguous)
    returns (outputs [B, T, H], hx [1, B, H])
    """
    B, T, D = inputs.shape
    H = w_hh.shape[0]
    out_dtype = inputs.dtype

    # Lane-dense hidden size and tiling.
    Hp = int(pl.cdiv(H, 128)) * 128
    TB = B if batch_block is None else int(batch_block)
    assert B % TB == 0, "batch_block must divide B"
    NB = B // TB
    TT = min(int(time_block), T)
    NT = int(pl.cdiv(T, TT))
    T_pad = NT * TT

    # lengths from mask, matches pack_padded_sequence semantics (t < length[b]).
    lengths = jnp.sum(mask.astype(jnp.int32), axis=1).reshape(B, 1)

    # Hoisted input projection: one big GEMM, time-major, lane-padded to Hp.
    wih_t = jnp.zeros((D, Hp), jnp.float32).at[:, :H].set(
        jnp.transpose(w_ih).astype(jnp.float32))
    bias = jnp.zeros((Hp,), jnp.float32).at[:H].set(
        (b_ih + b_hh).astype(jnp.float32))
    xproj = jnp.einsum("btd,dh->tbh", inputs.astype(jnp.float32), wih_t,
                       preferred_element_type=jnp.float32) + bias
    if T_pad != T:
        xproj = jnp.pad(xproj, ((0, T_pad - T), (0, 0), (0, 0)))
    xproj = xproj.astype(compute_dtype)

    # Recurrent weight, lane-padded (zero pad keeps padded h entries at exactly 0).
    whh_t = jnp.zeros((Hp, Hp), jnp.float32).at[:H, :H].set(
        jnp.transpose(w_hh).astype(jnp.float32)).astype(compute_dtype)

    grid_spec = pltpu.PrefetchScalarGridSpec(
        num_scalar_prefetch=0,
        grid=(NB, NT),
        in_specs=[
            pl.BlockSpec((TB, 1), lambda b, t: (b, 0)),           # lengths
            pl.BlockSpec((TT, TB, Hp), lambda b, t: (t, b, 0)),   # pre-activations
            pl.BlockSpec(memory_space=pltpu.MemorySpace.VMEM),    # W_hh^T (single copy)
        ],
        out_specs=[
            pl.BlockSpec((TT, TB, Hp), lambda b, t: (t, b, 0)),   # outputs (time-major)
            pl.BlockSpec((1, TB, Hp), lambda b, t: (0, b, 0)),    # hx (resident over t)
        ],
        scratch_shapes=[pltpu.VMEM((TB, Hp), jnp.float32)],
    )

    # Rough VMEM budget: single-buffered weight + double-buffered x/out blocks
    # + scratch/hx + slack; keep at least the default 32 MiB scoped limit.
    itemsize = jnp.dtype(compute_dtype).itemsize
    vmem_est = (Hp * Hp * itemsize
                + 2 * TT * TB * Hp * (itemsize + 4)   # x (compute dtype) + out (f32)
                + 4 * TB * Hp * 4
                + 64 * 1024)
    vmem_limit = max(32 * 1024 * 1024, int(2 * vmem_est))

    out_tbh, hx = pl.pallas_call(
        _masked_rnn_kernel,
        grid_spec=grid_spec,
        out_shape=(
            jax.ShapeDtypeStruct((T_pad, B, Hp), out_dtype),
            jax.ShapeDtypeStruct((1, B, Hp), out_dtype),
        ),
        compiler_params=pltpu.CompilerParams(
            dimension_semantics=("parallel", "arbitrary"),  # batch parallel, time sequential
            vmem_limit_bytes=vmem_limit,
        ),
    )(lengths, xproj, whh_t)

    outputs = jnp.transpose(out_tbh[:T, :, :H], (1, 0, 2))        # [B, T, H]
    return outputs, hx[:, :, :H]


def _reference_masked_rnn(inputs, mask, w_ih, w_hh, b_ih, b_hh):
    """Pure-JAX reference (same semantics as the PyTorch pack/unpack path)."""
    B, T, D = inputs.shape
    H = w_hh.shape[0]
    lengths = jnp.sum(mask.astype(jnp.int32), axis=1)

    def step(h, t):
        xt = inputs[:, t, :]
        h_new = jnp.tanh(xt @ w_ih.T + b_ih + h @ w_hh.T + b_hh)
        m = (t < lengths).astype(inputs.dtype)[:, None]
        h = m * h_new + (1.0 - m) * h
        return h, m * h_new

    h0 = jnp.zeros((B, H), inputs.dtype)
    h_last, outs = jax.lax.scan(step, h0, jnp.arange(T))
    return jnp.transpose(outs, (1, 0, 2)), h_last[None]


if __name__ == "__main__":
    B, T, D, H = 8, 8, 32, 32

    key = jax.random.PRNGKey(0)
    kx, kih, khh, kbi, kbh = jax.random.split(key, 5)

    x = jax.random.normal(kx, (B, T, D), dtype=jnp.float32)
    # nn.RNN parameter shapes: W_ih [H, D], W_hh [H, H], biases [H]
    scale = 1.0 / jnp.sqrt(jnp.float32(H))
    w_ih = jax.random.uniform(kih, (H, D), jnp.float32, -scale, scale)
    w_hh = jax.random.uniform(khh, (H, H), jnp.float32, -scale, scale)
    b_ih = jax.random.uniform(kbi, (H,), jnp.float32, -scale, scale)
    b_hh = jax.random.uniform(kbh, (H,), jnp.float32, -scale, scale)

    # Variable-length sequences (mask is contiguous from t=0, as pack assumes)
    lengths = jnp.array([8, 5, 3, 8, 1, 6, 4, 7], dtype=jnp.int32)
    mask = jnp.arange(T)[None, :] < lengths[:, None]               # [B, T] bool

    outputs, hx = masked_rnn_forward(x, mask, w_ih, w_hh, b_ih, b_hh)
    outputs = jax.block_until_ready(outputs)
    hx = jax.block_until_ready(hx)

    ref_out, ref_hx = _reference_masked_rnn(x, mask, w_ih, w_hh, b_ih, b_hh)
    assert outputs.shape == (B, T, H)
    assert hx.shape == (1, B, H)
    assert jnp.allclose(outputs, ref_out, atol=1e-5, rtol=1e-5)
    assert jnp.allclose(hx, ref_hx, atol=1e-5, rtol=1e-5)

    print("KERNEL_OK")
</pallas_src>

<mosaic_0001>
module attributes {stable_mosaic.version = 11 : i64} {
  func.func @_masked_rnn_kernel(%arg0: i32, %arg1: i32, %arg2: memref<8x1xi32, #tpu.memory_space<vmem>>, %arg3: memref<8x8x128xf32, #tpu.memory_space<vmem>>, %arg4: memref<128x128xf32, #tpu.memory_space<vmem>>, %arg5: memref<8x8x128xf32, #tpu.memory_space<vmem>>, %arg6: memref<1x8x128xf32, #tpu.memory_space<vmem>>, %arg7: memref<8x128xf32, #tpu.memory_space<vmem>>) attributes {dimension_semantics = [#tpu.dimension_semantics<parallel>, #tpu.dimension_semantics<arbitrary>], iteration_bounds = array<i64: 1, 1>, scalar_prefetch = 0 : i64, scratch_operands = 1 : i64, tpu.core_type = #tpu.core_type<tc>, window_params = [{transform_indices = @transform_0, window_bounds = array<i64: 8, 1>}, {transform_indices = @transform_1, window_bounds = array<i64: 8, 8, 128>}, {pipeline_mode = #tpu.pipeline_mode<synchronous>, transform_indices = @transform_2, window_bounds = array<i64: 128, 128>}, {transform_indices = @transform_3, window_bounds = array<i64: 8, 8, 128>}, {transform_indices = @transform_4, window_bounds = array<i64: 1, 8, 128>}]} {
    %c0_i32 = arith.constant 0 : i32
    %0 = arith.cmpi eq, %arg1, %c0_i32 : i32
    %1 = arith.extui %0 : i1 to i32
    %c0_i32_0 = arith.constant 0 : i32
    %2 = arith.cmpi ne, %1, %c0_i32_0 : i32
    scf.if %2 {
      %cst_81 = arith.constant 0.000000e+00 : f32
      %162 = vector.broadcast %cst_81 : f32 to vector<8x128xf32>
      %c0_82 = arith.constant 0 : index
      %c0_83 = arith.constant 0 : index
      %163 = vector.load %arg7[%c0_82, %c0_83] : memref<8x128xf32, #tpu.memory_space<vmem>>, vector<8x128xf32>
      tpu.vector_store %arg7[%c0_82, %c0_83], %162 {strides = array<i32>} : memref<8x128xf32, #tpu.memory_space<vmem>>, vector<8x128xf32>,
    } else {
    }
    %c0 = arith.constant 0 : index
    %c0_1 = arith.constant 0 : index
    %3 = vector.load %arg2[%c0, %c0_1] : memref<8x1xi32, #tpu.memory_space<vmem>>, vector<8x1xi32>
    %c8_i32 = arith.constant 8 : i32
    %4 = arith.muli %arg1, %c8_i32 : i32
    %c0_2 = arith.constant 0 : index
    %c0_3 = arith.constant 0 : index
    %5 = vector.load %arg7[%c0_2, %c0_3] : memref<8x128xf32, #tpu.memory_space<vmem>>, vector<8x128xf32>
    %c0_4 = arith.constant 0 : index
    %c0_5 = arith.constant 0 : index
    %c0_6 = arith.constant 0 : index
    %6 = vector.load %arg3[%c0_4, %c0_5, %c0_6] : memref<8x8x128xf32, #tpu.memory_space<vmem>>, vector<1x8x128xf32>
    %7 = vector.shape_cast %6 : vector<1x8x128xf32> to vector<8x128xf32>
    %c0_7 = arith.constant 0 : index
    %c0_8 = arith.constant 0 : index
    %8 = vector.load %arg4[%c0_7, %c0_8] : memref<128x128xf32, #tpu.memory_space<vmem>>, vector<128x128xf32>
    %cst = arith.constant dense<0.000000e+00> : vector<8x128xf32>
    %9 = tpu.matmul %5, %8, %cst {dimension_numbers = #tpu.dot_dimension_numbers<[1], [0], [0], [1], [0, 0, 1, 1], [], []>} : vector<8x128xf32>, vector<128x128xf32>, vector<8x128xf32> -> vector<8x128xf32>
    %10 = arith.addf %7, %9 : vector<8x128xf32>
    %11 = math.tanh %10 : vector<8x128xf32>
    %c0_i32_9 = arith.constant 0 : i32
    %12 = arith.addi %4, %c0_i32_9 : i32
    %13 = vector.broadcast %12 : i32 to vector<8x1xi32>
    %14 = arith.cmpi slt, %13, %3 : vector<8x1xi32>
    %cst_10 = arith.constant 0.000000e+00 : f32
    %15 = vector.shape_cast %14 : vector<8x1xi1> to vector<8x1xi1>
    %16 = vector.broadcast %15 : vector<8x1xi1> to vector<8x128xi1>
    %17 = vector.broadcast %cst_10 : f32 to vector<8x128xf32>
    %18 = arith.select %16, %11, %17 : vector<8x128xi1>, vector<8x128xf32>
    %c0_11 = arith.constant 0 : index
    %c0_12 = arith.constant 0 : index
    %c0_13 = arith.constant 0 : index
    %19 = vector.load %arg5[%c0_11, %c0_12, %c0_13] : memref<8x8x128xf32, #tpu.memory_space<vmem>>, vector<1x8x128xf32>
    %20 = vector.shape_cast %19 : vector<1x8x128xf32> to vector<8x128xf32>
    %21 = vector.shape_cast %18 : vector<8x128xf32> to vector<1x8x128xf32>
    tpu.vector_store %arg5[%c0_11, %c0_12, %c0_13], %21 {strides = array<i32>} : memref<8x8x128xf32, #tpu.memory_space<vmem>>, vector<1x8x128xf32>,
    %22 = vector.shape_cast %14 : vector<8x1xi1> to vector<8x1xi1>
    %23 = vector.broadcast %22 : vector<8x1xi1> to vector<8x128xi1>
    %24 = arith.select %23, %11, %5 : vector<8x128xi1>, vector<8x128xf32>
    %c1 = arith.constant 1 : index
    %c0_14 = arith.constant 0 : index
    %c0_15 = arith.constant 0 : index
    %25 = vector.load %arg3[%c1, %c0_14, %c0_15] : memref<8x8x128xf32, #tpu.memory_space<vmem>>, vector<1x8x128xf32>
    %26 = vector.shape_cast %25 : vector<1x8x128xf32> to vector<8x128xf32>
    %c0_16 = arith.constant 0 : index
    %c0_17 = arith.constant 0 : index
    %27 = vector.load %arg4[%c0_16, %c0_17] : memref<128x128xf32, #tpu.memory_space<vmem>>, vector<128x128xf32>
    %cst_18 = arith.constant dense<0.000000e+00> : vector<8x128xf32>
    %28 = tpu.matmul %24, %27, %cst_18 {dimension_numbers = #tpu.dot_dimension_numbers<[1], [0], [0], [1], [0, 0, 1, 1], [], []>} : vector<8x128xf32>, vector<128x128xf32>, vector<8x128xf32> -> vector<8x128xf32>
    %29 = arith.addf %26, %28 : vector<8x128xf32>
    %30 = math.tanh %29 : vector<8x128xf32>
    %c1_i32 = arith.constant 1 : i32
    %31 = arith.addi %4, %c1_i32 : i32
    %32 = vector.broadcast %31 : i32 to vector<8x1xi32>
    %33 = arith.cmpi slt, %32, %3 : vector<8x1xi32>
    %cst_19 = arith.constant 0.000000e+00 : f32
    %34 = vector.shape_cast %33 : vector<8x1xi1> to vector<8x1xi1>
    %35 = vector.broadcast %34 : vector<8x1xi1> to vector<8x128xi1>
    %36 = vector.broadcast %cst_19 : f32 to vector<8x128xf32>
    %37 = arith.select %35, %30, %36 : vector<8x128xi1>, vector<8x128xf32>
    %c1_20 = arith.constant 1 : index
    %c0_21 = arith.constant 0 : index
    %c0_22 = arith.constant 0 : index
    %38 = vector.load %arg5[%c1_20, %c0_21, %c0_22] : memref<8x8x128xf32, #tpu.memory_space<vmem>>, vector<1x8x128xf32>
    %39 = vector.shape_cast %38 : vector<1x8x128xf32> to vector<8x128xf32>
    %40 = vector.shape_cast %37 : vector<8x128xf32> to vector<1x8x128xf32>
    tpu.vector_store %arg5[%c1_20, %c0_21, %c0_22], %40 {strides = array<i32>} : memref<8x8x128xf32, #tpu.memory_space<vmem>>, vector<1x8x128xf32>,
    %41 = vector.shape_cast %33 : vector<8x1xi1> to vector<8x1xi1>
    %42 = vector.broadcast %41 : vector<8x1xi1> to vector<8x128xi1>
    %43 = arith.select %42, %30, %24 : vector<8x128xi1>, vector<8x128xf32>
    %c2 = arith.constant 2 : index
    %c0_23 = arith.constant 0 : index
    %c0_24 = arith.constant 0 : index
    %44 = vector.load %arg3[%c2, %c0_23, %c0_24] : memref<8x8x128xf32, #tpu.memory_space<vmem>>, vector<1x8x128xf32>
    %45 = vector.shape_cast %44 : vector<1x8x128xf32> to vector<8x128xf32>
    %c0_25 = arith.constant 0 : index
    %c0_26 = arith.constant 0 : index
    %46 = vector.load %arg4[%c0_25, %c0_26] : memref<128x128xf32, #tpu.memory_space<vmem>>, vector<128x128xf32>
    %cst_27 = arith.constant dense<0.000000e+00> : vector<8x128xf32>
    %47 = tpu.matmul %43, %46, %cst_27 {dimension_numbers = #tpu.dot_dimension_numbers<[1], [0], [0], [1], [0, 0, 1, 1], [], []>} : vector<8x128xf32>, vector<128x128xf32>, vector<8x128xf32> -> vector<8x128xf32>
    %48 = arith.addf %45, %47 : vector<8x128xf32>
    %49 = math.tanh %48 : vector<8x128xf32>
    %c2_i32 = arith.constant 2 : i32
    %50 = arith.addi %4, %c2_i32 : i32
    %51 = vector.broadcast %50 : i32 to vector<8x1xi32>
    %52 = arith.cmpi slt, %51, %3 : vector<8x1xi32>
    %cst_28 = arith.constant 0.000000e+00 : f32
    %53 = vector.shape_cast %52 : vector<8x1xi1> to vector<8x1xi1>
    %54 = vector.broadcast %53 : vector<8x1xi1> to vector<8x128xi1>
    %55 = vector.broadcast %cst_28 : f32 to vector<8x128xf32>
    %56 = arith.select %54, %49, %55 : vector<8x128xi1>, vector<8x128xf32>
    %c2_29 = arith.constant 2 : index
    %c0_30 = arith.constant 0 : index
    %c0_31 = arith.constant 0 : index
    %57 = vector.load %arg5[%c2_29, %c0_30, %c0_31] : memref<8x8x128xf32, #tpu.memory_space<vmem>>, vector<1x8x128xf32>
    %58 = vector.shape_cast %57 : vector<1x8x128xf32> to vector<8x128xf32>
    %59 = vector.shape_cast %56 : vector<8x128xf32> to vector<1x8x128xf32>
    tpu.vector_store %arg5[%c2_29, %c0_30, %c0_31], %59 {strides = array<i32>} : memref<8x8x128xf32, #tpu.memory_space<vmem>>, vector<1x8x128xf32>,
    %60 = vector.shape_cast %52 : vector<8x1xi1> to vector<8x1xi1>
    %61 = vector.broadcast %60 : vector<8x1xi1> to vector<8x128xi1>
    %62 = arith.select %61, %49, %43 : vector<8x128xi1>, vector<8x128xf32>
    %c3 = arith.constant 3 : index
    %c0_32 = arith.constant 0 : index
    %c0_33 = arith.constant 0 : index
    %63 = vector.load %arg3[%c3, %c0_32, %c0_33] : memref<8x8x128xf32, #tpu.memory_space<vmem>>, vector<1x8x128xf32>
    %64 = vector.shape_cast %63 : vector<1x8x128xf32> to vector<8x128xf32>
    %c0_34 = arith.constant 0 : index
    %c0_35 = arith.constant 0 : index
    %65 = vector.load %arg4[%c0_34, %c0_35] : memref<128x128xf32, #tpu.memory_space<vmem>>, vector<128x128xf32>
    %cst_36 = arith.constant dense<0.000000e+00> : vector<8x128xf32>
    %66 = tpu.matmul %62, %65, %cst_36 {dimension_numbers = #tpu.dot_dimension_numbers<[1], [0], [0], [1], [0, 0, 1, 1], [], []>} : vector<8x128xf32>, vector<128x128xf32>, vector<8x128xf32> -> vector<8x128xf32>
    %67 = arith.addf %64, %66 : vector<8x128xf32>
    %68 = math.tanh %67 : vector<8x128xf32>
    %c3_i32 = arith.constant 3 : i32
    %69 = arith.addi %4, %c3_i32 : i32
    %70 = vector.broadcast %69 : i32 to vector<8x1xi32>
    %71 = arith.cmpi slt, %70, %3 : vector<8x1xi32>
    %cst_37 = arith.constant 0.000000e+00 : f32
    %72 = vector.shape_cast %71 : vector<8x1xi1> to vector<8x1xi1>
    %73 = vector.broadcast %72 : vector<8x1xi1> to vector<8x128xi1>
    %74 = vector.broadcast %cst_37 : f32 to vector<8x128xf32>
    %75 = arith.select %73, %68, %74 : vector<8x128xi1>, vector<8x128xf32>
    %c3_38 = arith.constant 3 : index
    %c0_39 = arith.constant 0 : index
    %c0_40 = arith.constant 0 : index
    %76 = vector.load %arg5[%c3_38, %c0_39, %c0_40] : memref<8x8x128xf32, #tpu.memory_space<vmem>>, vector<1x8x128xf32>
    %77 = vector.shape_cast %76 : vector<1x8x128xf32> to vector<8x128xf32>
    %78 = vector.shape_cast %75 : vector<8x128xf32> to vector<1x8x128xf32>
    tpu.vector_store %arg5[%c3_38, %c0_39, %c0_40], %78 {strides = array<i32>} : memref<8x8x128xf32, #tpu.memory_space<vmem>>, vector<1x8x128xf32>,
    %79 = vector.shape_cast %71 : vector<8x1xi1> to vector<8x1xi1>
    %80 = vector.broadcast %79 : vector<8x1xi1> to vector<8x128xi1>
    %81 = arith.select %80, %68, %62 : vector<8x128xi1>, vector<8x128xf32>
    %c4 = arith.constant 4 : index
    %c0_41 = arith.constant 0 : index
    %c0_42 = arith.constant 0 : index
    %82 = vector.load %arg3[%c4, %c0_41, %c0_42] : memref<8x8x128xf32, #tpu.memory_space<vmem>>, vector<1x8x128xf32>
    %83 = vector.shape_cast %82 : vector<1x8x128xf32> to vector<8x128xf32>
    %c0_43 = arith.constant 0 : index
    %c0_44 = arith.constant 0 : index
    %84 = vector.load %arg4[%c0_43, %c0_44] : memref<128x128xf32, #tpu.memory_space<vmem>>, vector<128x128xf32>
    %cst_45 = arith.constant dense<0.000000e+00> : vector<8x128xf32>
    %85 = tpu.matmul %81, %84, %cst_45 {dimension_numbers = #tpu.dot_dimension_numbers<[1], [0], [0], [1], [0, 0, 1, 1], [], []>} : vector<8x128xf32>, vector<128x128xf32>, vector<8x128xf32> -> vector<8x128xf32>
    %86 = arith.addf %83, %85 : vector<8x128xf32>
    %87 = math.tanh %86 : vector<8x128xf32>
    %c4_i32 = arith.constant 4 : i32
    %88 = arith.addi %4, %c4_i32 : i32
    %89 = vector.broadcast %88 : i32 to vector<8x1xi32>
    %90 = arith.cmpi slt, %89, %3 : vector<8x1xi32>
    %cst_46 = arith.constant 0.000000e+00 : f32
    %91 = vector.shape_cast %90 : vector<8x1xi1> to vector<8x1xi1>
    %92 = vector.broadcast %91 : vector<8x1xi1> to vector<8x128xi1>
    %93 = vector.broadcast %cst_46 : f32 to vector<8x128xf32>
    %94 = arith.select %92, %87, %93 : vector<8x128xi1>, vector<8x128xf32>
    %c4_47 = arith.constant 4 : index
    %c0_48 = arith.constant 0 : index
    %c0_49 = arith.constant 0 : index
    %95 = vector.load %arg5[%c4_47, %c0_48, %c0_49] : memref<8x8x128xf32, #tpu.memory_space<vmem>>, vector<1x8x128xf32>
    %96 = vector.shape_cast %95 : vector<1x8x128xf32> to vector<8x128xf32>
    %97 = vector.shape_cast %94 : vector<8x128xf32> to vector<1x8x128xf32>
    tpu.vector_store %arg5[%c4_47, %c0_48, %c0_49], %97 {strides = array<i32>} : memref<8x8x128xf32, #tpu.memory_space<vmem>>, vector<1x8x128xf32>,
    %98 = vector.shape_cast %90 : vector<8x1xi1> to vector<8x1xi1>
    %99 = vector.broadcast %98 : vector<8x1xi1> to vector<8x128xi1>
    %100 = arith.select %99, %87, %81 : vector<8x128xi1>, vector<8x128xf32>
    %c5 = arith.constant 5 : index
    %c0_50 = arith.constant 0 : index
    %c0_51 = arith.constant 0 : index
    %101 = vector.load %arg3[%c5, %c0_50, %c0_51] : memref<8x8x128xf32, #tpu.memory_space<vmem>>, vector<1x8x128xf32>
    %102 = vector.shape_cast %101 : vector<1x8x128xf32> to vector<8x128xf32>
    %c0_52 = arith.constant 0 : index
    %c0_53 = arith.constant 0 : index
    %103 = vector.load %arg4[%c0_52, %c0_53] : memref<128x128xf32, #tpu.memory_space<vmem>>, vector<128x128xf32>
    %cst_54 = arith.constant dense<0.000000e+00> : vector<8x128xf32>
    %104 = tpu.matmul %100, %103, %cst_54 {dimension_numbers = #tpu.dot_dimension_numbers<[1], [0], [0], [1], [0, 0, 1, 1], [], []>} : vector<8x128xf32>, vector<128x128xf32>, vector<8x128xf32> -> vector<8x128xf32>
    %105 = arith.addf %102, %104 : vector<8x128xf32>
    %106 = math.tanh %105 : vector<8x128xf32>
    %c5_i32 = arith.constant 5 : i32
    %107 = arith.addi %4, %c5_i32 : i32
    %108 = vector.broadcast %107 : i32 to vector<8x1xi32>
    %109 = arith.cmpi slt, %108, %3 : vector<8x1xi32>
    %cst_55 = arith.constant 0.000000e+00 : f32
    %110 = vector.shape_cast %109 : vector<8x1xi1> to vector<8x1xi1>
    %111 = vector.broadcast %110 : vector<8x1xi1> to vector<8x128xi1>
    %112 = vector.broadcast %cst_55 : f32 to vector<8x128xf32>
    %113 = arith.select %111, %106, %112 : vector<8x128xi1>, vector<8x128xf32>
    %c5_56 = arith.constant 5 : index
    %c0_57 = arith.constant 0 : index
    %c0_58 = arith.constant 0 : index
    %114 = vector.load %arg5[%c5_56, %c0_57, %c0_58] : memref<8x8x128xf32, #tpu.memory_space<vmem>>, vector<1x8x128xf32>
    %115 = vector.shape_cast %114 : vector<1x8x128xf32> to vector<8x128xf32>
    %116 = vector.shape_cast %113 : vector<8x128xf32> to vector<1x8x128xf32>
    tpu.vector_store %arg5[%c5_56, %c0_57, %c0_58], %116 {strides = array<i32>} : memref<8x8x128xf32, #tpu.memory_space<vmem>>, vector<1x8x128xf32>,
    %117 = vector.shape_cast %109 : vector<8x1xi1> to vector<8x1xi1>
    %118 = vector.broadcast %117 : vector<8x1xi1> to vector<8x128xi1>
    %119 = arith.select %118, %106, %100 : vector<8x128xi1>, vector<8x128xf32>
    %c6 = arith.constant 6 : index
    %c0_59 = arith.constant 0 : index
    %c0_60 = arith.constant 0 : index
    %120 = vector.load %arg3[%c6, %c0_59, %c0_60] : memref<8x8x128xf32, #tpu.memory_space<vmem>>, vector<1x8x128xf32>
    %121 = vector.shape_cast %120 : vector<1x8x128xf32> to vector<8x128xf32>
    %c0_61 = arith.constant 0 : index
    %c0_62 = arith.constant 0 : index
    %122 = vector.load %arg4[%c0_61, %c0_62] : memref<128x128xf32, #tpu.memory_space<vmem>>, vector<128x128xf32>
    %cst_63 = arith.constant dense<0.000000e+00> : vector<8x128xf32>
    %123 = tpu.matmul %119, %122, %cst_63 {dimension_numbers = #tpu.dot_dimension_numbers<[1], [0], [0], [1], [0, 0, 1, 1], [], []>} : vector<8x128xf32>, vector<128x128xf32>, vector<8x128xf32> -> vector<8x128xf32>
    %124 = arith.addf %121, %123 : vector<8x128xf32>
    %125 = math.tanh %124 : vector<8x128xf32>
    %c6_i32 = arith.constant 6 : i32
    %126 = arith.addi %4, %c6_i32 : i32
    %127 = vector.broadcast %126 : i32 to vector<8x1xi32>
    %128 = arith.cmpi slt, %127, %3 : vector<8x1xi32>
    %cst_64 = arith.constant 0.000000e+00 : f32
    %129 = vector.shape_cast %128 : vector<8x1xi1> to vector<8x1xi1>
    %130 = vector.broadcast %129 : vector<8x1xi1> to vector<8x128xi1>
    %131 = vector.broadcast %cst_64 : f32 to vector<8x128xf32>
    %132 = arith.select %130, %125, %131 : vector<8x128xi1>, vector<8x128xf32>
    %c6_65 = arith.constant 6 : index
    %c0_66 = arith.constant 0 : index
    %c0_67 = arith.constant 0 : index
    %133 = vector.load %arg5[%c6_65, %c0_66, %c0_67] : memref<8x8x128xf32, #tpu.memory_space<vmem>>, vector<1x8x128xf32>
    %134 = vector.shape_cast %133 : vector<1x8x128xf32> to vector<8x128xf32>
    %135 = vector.shape_cast %132 : vector<8x128xf32> to vector<1x8x128xf32>
    tpu.vector_store %arg5[%c6_65, %c0_66, %c0_67], %135 {strides = array<i32>} : memref<8x8x128xf32, #tpu.memory_space<vmem>>, vector<1x8x128xf32>,
    %136 = vector.shape_cast %128 : vector<8x1xi1> to vector<8x1xi1>
    %137 = vector.broadcast %136 : vector<8x1xi1> to vector<8x128xi1>
    %138 = arith.select %137, %125, %119 : vector<8x128xi1>, vector<8x128xf32>
    %c7 = arith.constant 7 : index
    %c0_68 = arith.constant 0 : index
    %c0_69 = arith.constant 0 : index
    %139 = vector.load %arg3[%c7, %c0_68, %c0_69] : memref<8x8x128xf32, #tpu.memory_space<vmem>>, vector<1x8x128xf32>
    %140 = vector.shape_cast %139 : vector<1x8x128xf32> to vector<8x128xf32>
    %c0_70 = arith.constant 0 : index
    %c0_71 = arith.constant 0 : index
    %141 = vector.load %arg4[%c0_70, %c0_71] : memref<128x128xf32, #tpu.memory_space<vmem>>, vector<128x128xf32>
    %cst_72 = arith.constant dense<0.000000e+00> : vector<8x128xf32>
    %142 = tpu.matmul %138, %141, %cst_72 {dimension_numbers = #tpu.dot_dimension_numbers<[1], [0], [0], [1], [0, 0, 1, 1], [], []>} : vector<8x128xf32>, vector<128x128xf32>, vector<8x128xf32> -> vector<8x128xf32>
    %143 = arith.addf %140, %142 : vector<8x128xf32>
    %144 = math.tanh %143 : vector<8x128xf32>
    %c7_i32 = arith.constant 7 : i32
    %145 = arith.addi %4, %c7_i32 : i32
    %146 = vector.broadcast %145 : i32 to vector<8x1xi32>
    %147 = arith.cmpi slt, %146, %3 : vector<8x1xi32>
    %cst_73 = arith.constant 0.000000e+00 : f32
    %148 = vector.shape_cast %147 : vector<8x1xi1> to vector<8x1xi1>
    %149 = vector.broadcast %148 : vector<8x1xi1> to vector<8x128xi1>
    %150 = vector.broadcast %cst_73 : f32 to vector<8x128xf32>
    %151 = arith.select %149, %144, %150 : vector<8x128xi1>, vector<8x128xf32>
    %c7_74 = arith.constant 7 : index
    %c0_75 = arith.constant 0 : index
    %c0_76 = arith.constant 0 : index
    %152 = vector.load %arg5[%c7_74, %c0_75, %c0_76] : memref<8x8x128xf32, #tpu.memory_space<vmem>>, vector<1x8x128xf32>
    %153 = vector.shape_cast %152 : vector<1x8x128xf32> to vector<8x128xf32>
    %154 = vector.shape_cast %151 : vector<8x128xf32> to vector<1x8x128xf32>
    tpu.vector_store %arg5[%c7_74, %c0_75, %c0_76], %154 {strides = array<i32>} : memref<8x8x128xf32, #tpu.memory_space<vmem>>, vector<1x8x128xf32>,
    %155 = vector.shape_cast %147 : vector<8x1xi1> to vector<8x1xi1>
    %156 = vector.broadcast %155 : vector<8x1xi1> to vector<8x128xi1>
    %157 = arith.select %156, %144, %138 : vector<8x128xi1>, vector<8x128xf32>
    %c0_77 = arith.constant 0 : index
    %c0_78 = arith.constant 0 : index
    %158 = vector.load %arg7[%c0_77, %c0_78] : memref<8x128xf32, #tpu.memory_space<vmem>>, vector<8x128xf32>
    tpu.vector_store %arg7[%c0_77, %c0_78], %157 {strides = array<i32>} : memref<8x128xf32, #tpu.memory_space<vmem>>, vector<8x128xf32>,
    %c0_i32_79 = arith.constant 0 : i32
    %159 = arith.cmpi eq, %arg1, %c0_i32_79 : i32
    %160 = arith.extui %159 : i1 to i32
    %c0_i32_80 = arith.constant 0 : i32
    %161 = arith.cmpi ne, %160, %c0_i32_80 : i32
    scf.if %161 {
      %c0_81 = arith.constant 0 : index
      %c0_82 = arith.constant 0 : index
      %c0_83 = arith.constant 0 : index
      %162 = vector.load %arg6[%c0_81, %c0_82, %c0_83] : memref<1x8x128xf32, #tpu.memory_space<vmem>>, vector<1x8x128xf32>
      %163 = vector.shape_cast %162 : vector<1x8x128xf32> to vector<8x128xf32>
      %164 = vector.shape_cast %157 : vector<8x128xf32> to vector<1x8x128xf32>
      tpu.vector_store %arg6[%c0_81, %c0_82, %c0_83], %164 {strides = array<i32>} : memref<1x8x128xf32, #tpu.memory_space<vmem>>, vector<1x8x128xf32>,
    } else {
    }
    return
  }
  func.func @transform_0(%arg0: i32, %arg1: i32) -> (i32, i32) {
    %c0_i32 = arith.constant 0 : i32
    %c0_i32_0 = arith.constant 0 : i32
    return %arg0, %c0_i32 : i32, i32
  }
  func.func @transform_1(%arg0: i32, %arg1: i32) -> (i32, i32, i32) {
    %c0_i32 = arith.constant 0 : i32
    %c0_i32_0 = arith.constant 0 : i32
    return %arg1, %arg0, %c0_i32 : i32, i32, i32
  }
  func.func @transform_2(%arg0: i32, %arg1: i32) -> (i32, i32) {
    %c0_i32 = arith.constant 0 : i32
    %c0_i32_0 = arith.constant 0 : i32
    %c0_i32_1 = arith.constant 0 : i32
    return %c0_i32, %c0_i32_0 : i32, i32
  }
  func.func @transform_3(%arg0: i32, %arg1: i32) -> (i32, i32, i32) {
    %c0_i32 = arith.constant 0 : i32
    %c0_i32_0 = arith.constant 0 : i32
    return %arg1, %arg0, %c0_i32 : i32, i32, i32
  }
  func.func @transform_4(%arg0: i32, %arg1: i32) -> (i32, i32, i32) {
    %c0_i32 = arith.constant 0 : i32
    %c0_i32_0 = arith.constant 0 : i32
    %c0_i32_1 = arith.constant 0 : i32
    return %c0_i32, %arg0, %c0_i32_0 : i32, i32, i32
  }
}

</mosaic_0001>

<bundles_post_ra>
// kernel: tpu_custom_call.1
= control target key start
LH: loop header
LB: loop body
LE: loop exit
PB: predicated region body
PF: predicated region fallthrough
CT: control target
= control target key end

     0   :  { %10 = vsyncpa [#allocation4], 0  ;;  %s1827_s0 = inlined_call_operand.vmem [shape: s32[8,1], index: 0, kind: input, shape index: {}]   ;;  %s1828_s1 = inlined_call_operand.hbm [shape: f32[8,8,128], index: 1, kind: input, shape index: {}]   ;;  %s1829_s2 = inlined_call_operand.hbm [shape: f32[128,128], index: 2, kind: input, shape index: {}]   ;;  %s1830_s3 = inlined_call_operand.hbm [shape: f32[8,8,128], index: 3, kind: output, shape index: {0}]   ;;  %s1831_s4 = inlined_call_operand.hbm [shape: f32[1,8,128], index: 4, kind: output, shape index: {1}]  }
   0x1   :  { %11 = vsyncpa [#allocation7], 0 }
   0x2   :  { %12 = vsyncpa [#allocation5], 0 }
   0x3   :  { %13 = vsyncpa [#allocation10], 0  ;;  %s1444_s15 = smov [#allocation3]  }
   0x4   :  { %s21_s16 = sshll.u32 %s1444_s15, 4  ;;  %s22_s16 = int_to_ptr.vmem [resolvable:$true] %s21_s16 }
   0x5   :  { %s1364_s17 = scalar_lea.vmem %s22_s16, 1024  ;;  %p1369_p1 = scmp.lt.s32.totalorder %s22_s16, %s22_s16 }
   0x6   :  { %p1365_p0 = scmp.ne.s32.totalorder %s22_s16, %s1364_s17  ;;  %p1370_p2 = scmp.lt.s32.totalorder %s1364_s17, %s1364_s17 }
   0x8   :  { %p1371_p3 = por %p1370_p2, %p1369_p1 }
   0xa   :  { %p1372_p4 = pnand %p1371_p3, %p1365_p0 }
   0xc   :  { %1375 = shalt.err (!%p1372_p4)
}
   0xd   :  { %s1445_s18 = smov 128   ;;  %s1446_s19 = smov 8  }
   0xe   :  { %27 = dma.hbm_to_vmem [thread:$0]  %s1828_s1, 1024, %s22_s16, [#allocation4], %s1445_s18, %s1445_s18, %s1446_s19  }
   0xf   :  { %s1447_s22 = smov [#allocation6]  }
  0x10   :  { %s33_s23 = sshll.u32 %s1447_s22, 4  ;;  %s34_s23 = int_to_ptr.vmem [resolvable:$true] %s33_s23 }
  0x11   :  { %s1384_s24 = scalar_lea.vmem %s34_s23, 2048  ;;  %p1389_p6 = scmp.lt.s32.totalorder %s34_s23, %s34_s23 }
  0x12   :  { %p1385_p5 = scmp.ne.s32.totalorder %s34_s23, %s1384_s24  ;;  %p1390_p7 = scmp.lt.s32.totalorder %s1384_s24, %s1384_s24 }
  0x14   :  { %p1391_p8 = por %p1390_p7, %p1389_p6 }
  0x16   :  { %p1392_p9 = pnand %p1391_p8, %p1385_p5 }
  0x18   :  { %1395 = shalt.err (!%p1392_p9)
}
  0x19   :  { %39 = dma.hbm_to_vmem [thread:$0]  %s1829_s2, 2048, %s34_s23, [#allocation7], %s1445_s18, %s1445_s18, %s1446_s19  }
  0x1a   :  { %1436 = dma.done.wait [#allocation4], 1024  }
  0x1b   :  { %1437 = vsyncadd [#allocation4], 4294966272 }
  0x1c   :  { %1438 = dma.done.wait [#allocation7], 2048  }
  0x1d   :  { %1439 = vsyncadd [#allocation7], 4294965248  ;;  %v1448_v0 = vmov 0.0   ;;  %vm1449_vm0 = vmmov 0   ;;  %v1450_v1 = vmov 0   ;;  %v1498_v2 = vld [vmem:[#allocation6 + $0x78] sm:$0xff] }
  0x1e   :  { %1049 = vmatprep.subr.mxu0 %v1448_v0  ;;  %1081 = vmatprep.mubr.msk.f32.mxu0 %vm1449_vm0, %v1448_v0  ;;  %v1500_v3 = vld [vmem:[#allocation6 + $0x70] sm:$0xff]  ;;  %v1505_v4 = vld [vmem:[#allocation6 + $0x68] sm:$0xff]  ;;  %v1511_v5 = vld [vmem:[#allocation6 + $0x60] sm:$0xff]  ;;  %s1452_s28 = smov [#allocation9]  }
  0x1f   :  { %1338 = vset.pattern.permute.xlu0 %v1450_v1  ;;  %1084 = vmatprep.subr.mxu1 %v1448_v0  ;;  %v1518_v6 = vld [vmem:[%s1827_s0] sm:$0xff]  ;;  %v1522_v7 = vld [vmem:[#allocation6 + $0x58] sm:$0xff]  ;;  %v1531_v9 = vld [vmem:[#allocation6 + $0x50] sm:$0xff]  ;;  %s1451_s0 = smov [#allocation8]   ;;  %s890_s29 = sshll.u32 %s1452_s28, 4  ;;  %s891_s29 = int_to_ptr.vmem [resolvable:$true] %s890_s29 }
  0x20   :  { %1116 = vmatprep.mubr.msk.f32.mxu1 %vm1449_vm0, %v1448_v0  ;;  %1339 = vset.pattern.permute.xlu1 %v1450_v1  ;;  %vm904_vm1 = vcmp.gt.s32.totalorder %v1518_v6, 0  ;;  %vm905_vm2 = vcmp.gt.s32.totalorder %v1518_v6, 1  ;;  %v1537_v11 = vld [vmem:[#allocation6 + $0x48] sm:$0xff]  ;;  %vm908_vm3 = vcmp.gt.s32.totalorder %v1518_v6, 4  ;;  %v1544_v12 = vld [vmem:[#allocation6 + $0x40] sm:$0xff]  ;;  %v1550_v14 = vld [vmem:[#allocation6 + $0x38] sm:$0xff] }
  0x21   :  { %1050 = vmatpush3.msra.mxu0 %v1498_v2  ;;  %1085 = vmatpush3.msra.mxu1 %v1498_v2  ;;  %v145_v8 = vsel %vm904_vm1, 1, %v1450_v1  ;;  %v246_v10 = vsel %vm905_vm2, 1, %v1450_v1  ;;  %v552_v13 = vsel %vm908_vm3, 1, %v1450_v1  ;;  %vm910_vm4 = vcmp.gt.s32.totalorder %v1518_v6, 6  ;;  %v1557_v15 = vld [vmem:[#allocation6 + $0x30] sm:$0xff]  ;;  %v1563_v17 = vld [vmem:[#allocation6 + $0x28] sm:$0xff] }
  0x22   :  { %1051 = vmatprep.subr.mxu0 %v1448_v0  ;;  %1086 = vmatprep.subr.mxu1 %v1448_v0  ;;  %v756_v16 = vsel %vm910_vm4, 1, %v1450_v1  ;;  %v1569_v18 = vld [vmem:[#allocation6 + $0x20] sm:$0xff]  ;;  %v1574_v19 = vld [vmem:[#allocation6 + $0x18] sm:$0xff]  ;;  %v1580_v20 = vld [vmem:[#allocation6 + $0x10] sm:$0xff]  ;;  %vm906_vm6 = vcmp.gt.s32.totalorder %v1518_v6, 2  ;;  %vm907_vm7 = vcmp.gt.s32.totalorder %v1518_v6, 3 }
  0x23   :  { %1052 = vmatpush3.msra.mxu0 %v1500_v3  ;;  %1087 = vmatpush3.msra.mxu1 %v1500_v3  ;;  %v1586_v21 = vld [vmem:[#allocation6 + $0x8] sm:$0xff]  ;;  %v1592_v22 = vld [vmem:[#allocation6] sm:$0xff]  ;;  %v348_v30 = vsel %vm906_vm6, 1, %v1450_v1  ;;  %v450_v31 = vsel %vm907_vm7, 1, %v1450_v1  ;;  %vm909_vm8 = vcmp.gt.s32.totalorder %v1518_v6, 5  ;;  %vm911_vm9 = vcmp.gt.s32.totalorder %v1518_v6, 7 }
  0x24   :  { %1053 = vmatprep.subr.mxu0 %v1448_v0  ;;  %1088 = vmatprep.subr.mxu1 %v1448_v0  ;;  %v54_v23 = vld [vmem:[#allocation3] sm:$0xff]  ;;  %v654_v32 = vsel %vm909_vm8, 1, %v1450_v1  ;;  %v858_v33 = vsel %vm911_vm9, 1, %v1450_v1  ;;  %v154_v34 = vld [vmem:[#allocation3 + $0x8] sm:$0xff]  ;;  %v256_v42 = vld [vmem:[#allocation3 + $0x10] sm:$0xff]  ;;  %s877_s27 = sshll.u32 %s1451_s0, 4  ;;  %s878_s27 = int_to_ptr.vmem [resolvable:$true] %s877_s27 }
  0x25   :  { %1054 = vmatpush3.msra.mxu0 %v1505_v4  ;;  %1089 = vmatpush3.msra.mxu1 %v1505_v4  ;;  %v358_v50 = vld [vmem:[#allocation3 + $0x18] sm:$0xff]  ;;  %v460_v58 = vld [vmem:[#allocation3 + $0x20] sm:$0xff]  ;;  %s1396_s30 = scalar_lea.vmem %s878_s27, 1024  ;;  %p1401_p11 = scmp.lt.s32.totalorder %s878_s27, %s878_s27 }
  0x26   :  { %1055 = vmatprep.subr.mxu0 %v1448_v0  ;;  %1090 = vmatprep.subr.mxu1 %v1448_v0  ;;  %p1397_p10 = scmp.ne.s32.totalorder %s878_s27, %s1396_s30  ;;  %p1402_p12 = scmp.lt.s32.totalorder %s1396_s30, %s1396_s30 }
  0x27   :  { %1056 = vmatpush3.msra.mxu0 %v1511_v5  ;;  %1091 = vmatpush3.msra.mxu1 %v1511_v5 }
  0x28   :  { %1057 = vmatprep.subr.mxu0 %v1448_v0  ;;  %147 = vperm.xlu0 %1338, %v145_v8   ;;  %p1403_p13 = por %p1402_p12, %p1401_p11 }
  0x29   :  { %1058 = vmatpush3.msra.mxu0 %v1522_v7  ;;  %1092 = vmatprep.subr.mxu1 %v1448_v0 }
  0x2a   :  { %1059 = vmatprep.subr.mxu0 %v1448_v0  ;;  %1093 = vmatpush3.msra.mxu1 %v1522_v7  ;;  %p1404_p0 = pnand %p1403_p13, %p1397_p10 }
  0x2b   :  { %1060 = vmatpush3.msra.mxu0 %v1531_v9  ;;  %1094 = vmatprep.subr.mxu1 %v1448_v0 }
  0x2c   :  { %1061 = vmatprep.subr.mxu0 %v1448_v0  ;;  %248 = vperm.xlu0 %1338, %v246_v10  }
  0x2d   :  { %1062 = vmatpush3.msra.mxu0 %v1537_v11  ;;  %1095 = vmatpush3.msra.mxu1 %v1531_v9 }
  0x2e   :  { %1063 = vmatprep.subr.mxu0 %v1448_v0  ;;  %1096 = vmatprep.subr.mxu1 %v1448_v0 }
  0x2f   :  { %1064 = vmatpush3.msra.mxu0 %v1544_v12  ;;  %1097 = vmatpush3.msra.mxu1 %v1537_v11 }
  0x30   :  { %1065 = vmatprep.subr.mxu0 %v1448_v0  ;;  %554 = vperm.xlu0 %1338, %v552_v13  }
  0x31   :  { %1066 = vmatpush3.msra.mxu0 %v1550_v14  ;;  %1098 = vmatprep.subr.mxu1 %v1448_v0 }
  0x32   :  { %1067 = vmatprep.subr.mxu0 %v1448_v0  ;;  %1099 = vmatpush3.msra.mxu1 %v1544_v12 }
  0x33   :  { %1068 = vmatpush3.msra.mxu0 %v1557_v15  ;;  %1100 = vmatprep.subr.mxu1 %v1448_v0 }
  0x34   :  { %1069 = vmatprep.subr.mxu0 %v1448_v0  ;;  %758 = vperm.xlu0 %1338, %v756_v16  }
  0x35   :  { %1070 = vmatpush3.msra.mxu0 %v1563_v17  ;;  %1101 = vmatpush3.msra.mxu1 %v1550_v14 }
  0x36   :  { %1071 = vmatprep.subr.mxu0 %v1448_v0  ;;  %1102 = vmatprep.subr.mxu1 %v1448_v0 }
  0x37   :  { %1072 = vmatpush3.msra.mxu0 %v1569_v18  ;;  %1103 = vmatpush3.msra.mxu1 %v1557_v15 }
  0x38   :  { %1073 = vmatprep.subr.mxu0 %v1448_v0  ;;  %1104 = vmatprep.subr.mxu1 %v1448_v0 }
  0x39   :  { %1074 = vmatpush3.msra.mxu0 %v1574_v19  ;;  %1105 = vmatpush3.msra.mxu1 %v1563_v17 }
  0x3a   :  { %1075 = vmatprep.subr.mxu0 %v1448_v0  ;;  %1106 = vmatprep.subr.mxu1 %v1448_v0 }
  0x3b   :  { %1076 = vmatpush3.msra.mxu0 %v1580_v20  ;;  %1107 = vmatpush3.msra.mxu1 %v1569_v18 }
  0x3c   :  { %1077 = vmatprep.subr.mxu0 %v1448_v0  ;;  %1108 = vmatprep.subr.mxu1 %v1448_v0 }
  0x3d   :  { %1078 = vmatpush3.msra.mxu0 %v1586_v21  ;;  %1109 = vmatpush3.msra.mxu1 %v1574_v19 }
  0x3e   :  { %1079 = vmatprep.subr.mxu0 %v1448_v0  ;;  %1110 = vmatprep.subr.mxu1 %v1448_v0 }
  0x3f   :  { %1080 = vmatpush3.msra.mxu0 %v1592_v22  ;;  %1111 = vmatpush3.msra.mxu1 %v1580_v20 }
  0x40   :  { %1082 = vmatmul.mubr.f32.vlgmr.msra.gmra.mxu0 %v1448_v0  ;;  %1112 = vmatprep.subr.mxu1 %v1448_v0 }
  0x41   :  { %1113 = vmatpush3.msra.mxu1 %v1586_v21  ;;  %1119 = vmatprep.subr.mxu0 %v1448_v0 }
  0x42   :  { %1114 = vmatprep.subr.mxu1 %v1448_v0  ;;  %1120 = vmatpush3.msra.mxu0 %v1498_v2 }
  0x43   :  { %1115 = vmatpush3.msra.mxu1 %v1592_v22  ;;  %1121 = vmatprep.subr.mxu0 %v1448_v0 }
  0x44   :  { %1122 = vmatpush3.msra.mxu0 %v1500_v3  ;;  %1151 = vmatprep.mubr.msk.f32.mxu0 %vm1449_vm0, %v1448_v0 }
  0x45   :  { %1123 = vmatprep.subr.mxu0 %v1448_v0  ;;  %1154 = vmatprep.subr.mxu1 %v1448_v0 }
  0x46   :  { %1124 = vmatpush3.msra.mxu0 %v1505_v4  ;;  %350 = vperm.xlu1 %1339, %v348_v30  }
  0x47   :  { %1125 = vmatprep.subr.mxu0 %v1448_v0 }
  0x48   :  { %1126 = vmatpush3.msra.mxu0 %v1511_v5 }
  0x49   :  { %1127 = vmatprep.subr.mxu0 %v1448_v0 }
  0x4a   :  { %1128 = vmatpush3.msra.mxu0 %v1522_v7  ;;  %452 = vperm.xlu1 %1339, %v450_v31  }
  0x4b   :  { %1129 = vmatprep.subr.mxu0 %v1448_v0 }
  0x4c   :  { %1130 = vmatpush3.msra.mxu0 %v1531_v9 }
  0x4d   :  { %1131 = vmatprep.subr.mxu0 %v1448_v0 }
  0x4e   :  { %1132 = vmatpush3.msra.mxu0 %v1537_v11  ;;  %656 = vperm.xlu1 %1339, %v654_v32  }
  0x4f   :  { %1133 = vmatprep.subr.mxu0 %v1448_v0 }
  0x50   :  { %1134 = vmatpush3.msra.mxu0 %v1544_v12 }
  0x51   :  { %1135 = vmatprep.subr.mxu0 %v1448_v0 }
  0x52   :  { %1136 = vmatpush3.msra.mxu0 %v1550_v14  ;;  %860 = vperm.xlu1 %1339, %v858_v33  }
  0x53   :  { %1137 = vmatprep.subr.mxu0 %v1448_v0 }
  0x54   :  { %1138 = vmatpush3.msra.mxu0 %v1557_v15 }
  0x55   :  { %1139 = vmatprep.subr.mxu0 %v1448_v0 }
  0x56   :  { %1140 = vmatpush3.msra.mxu0 %v1563_v17 }
  0x57   :  { %1141 = vmatprep.subr.mxu0 %v1448_v0 }
  0x58   :  { %1142 = vmatpush3.msra.mxu0 %v1569_v18 }
  0x59   :  { %1143 = vmatprep.subr.mxu0 %v1448_v0 }
  0x5a   :  { %1144 = vmatpush3.msra.mxu0 %v1574_v19 }
  0x5b   :  { %1145 = vmatprep.subr.mxu0 %v1448_v0 }
  0x5c   :  { %1146 = vmatpush3.msra.mxu0 %v1580_v20 }
  0x5d   :  { %1147 = vmatprep.subr.mxu0 %v1448_v0 }
  0x5e   :  { %1148 = vmatpush3.msra.mxu0 %v1586_v21 }
  0x5f   :  { %1149 = vmatprep.subr.mxu0 %v1448_v0 }
  0x60   :  { %1150 = vmatpush3.msra.mxu0 %v1592_v22 }
  0x61   :  { %1189 = vmatprep.subr.mxu0 %v1448_v0 }
  0xa3   :  { %v148_v27 = vpop.permute.xlu0 %147 }
  0xa4   :  { %vm149_vm5 = vcmp.eq.s32.totalorder %v148_v27, 1 }
  0xa7   :  { %v249_v38 = vpop.permute.xlu0 %248 }
  0xa8   :  { %vm250_vm10 = vcmp.eq.s32.totalorder %v249_v38, 1 }
  0xab   :  { %v555_v62 = vpop.permute.xlu0 %554 }
  0xac   :  { %vm556_vm13 = vcmp.eq.s32.totalorder %v555_v62, 1 }
  0xc1   :  { %v351_v46 = vpop.permute.xlu1 %350 }
  0xc2   :  { %vm352_vm11 = vcmp.eq.s32.totalorder %v351_v46, 1 }
  0xc5   :  { %v453_v54 = vpop.permute.xlu1 %452 }
  0xc6   :  { %vm454_vm12 = vcmp.eq.s32.totalorder %v453_v54, 1 }
 0x100   :  { %v137_v24 = vpop.f32.mrf.mxu0 }
 0x101   :  { %v141_v25 = vadd.f32 %v137_v24, %v54_v23 }
 0x102   :  { %v1083_v26 = vpop.f32.mrf.mxu0 }
 0x103   :  { %1340 = vtanh.f32 %v141_v25 }
 0x110   :  { %v1341_v28 = vpop.eup %1340 }
 0x111   :  { %v150_v29 = vsel %vm149_vm5, %v1341_v28, 0.0  ;;  %1117 = vmatmul.mubr.msk.f32.vlgmr.msra.gmra.mxu1 %vm149_vm5, %v1341_v28 }
 0x112   :  { %151 = vst [vmem:[#allocation8] sm:$0xff] %v150_v29  ;;  %1155 = vmatpush3.msra.mxu1 %v1498_v2  ;;  %1186 = vmatprep.mubr.msk.f32.mxu1 %vm1449_vm0, %v1448_v0 }
 0x113   :  { %1156 = vmatprep.subr.mxu1 %v1448_v0 }
 0x114   :  { %1157 = vmatpush3.msra.mxu1 %v1500_v3 }
 0x115   :  { %1158 = vmatprep.subr.mxu1 %v1448_v0 }
 0x116   :  { %1159 = vmatpush3.msra.mxu1 %v1505_v4 }
 0x117   :  { %1160 = vmatprep.subr.mxu1 %v1448_v0 }
 0x118   :  { %1161 = vmatpush3.msra.mxu1 %v1511_v5 }
 0x119   :  { %1162 = vmatprep.subr.mxu1 %v1448_v0 }
 0x11a   :  { %1163 = vmatpush3.msra.mxu1 %v1522_v7 }
 0x11b   :  { %1164 = vmatprep.subr.mxu1 %v1448_v0 }
 0x11c   :  { %1165 = vmatpush3.msra.mxu1 %v1531_v9 }
 0x11d   :  { %1166 = vmatprep.subr.mxu1 %v1448_v0 }
 0x11e   :  { %1167 = vmatpush3.msra.mxu1 %v1537_v11 }
 0x11f   :  { %1168 = vmatprep.subr.mxu1 %v1448_v0 }
 0x120   :  { %1169 = vmatpush3.msra.mxu1 %v1544_v12 }
 0x121   :  { %1170 = vmatprep.subr.mxu1 %v1448_v0 }
 0x122   :  { %1171 = vmatpush3.msra.mxu1 %v1550_v14 }
 0x123   :  { %1172 = vmatprep.subr.mxu1 %v1448_v0 }
 0x124   :  { %1173 = vmatpush3.msra.mxu1 %v1557_v15 }
 0x125   :  { %1174 = vmatprep.subr.mxu1 %v1448_v0 }
 0x126   :  { %1175 = vmatpush3.msra.mxu1 %v1563_v17 }
 0x127   :  { %1176 = vmatprep.subr.mxu1 %v1448_v0 }
 0x128   :  { %1177 = vmatpush3.msra.mxu1 %v1569_v18 }
 0x129   :  { %1178 = vmatprep.subr.mxu1 %v1448_v0 }
 0x12a   :  { %1179 = vmatpush3.msra.mxu1 %v1574_v19 }
 0x12b   :  { %1180 = vmatprep.subr.mxu1 %v1448_v0 }
 0x12c   :  { %1181 = vmatpush3.msra.mxu1 %v1580_v20 }
 0x12d   :  { %1182 = vmatprep.subr.mxu1 %v1448_v0 }
 0x12e   :  { %1183 = vmatpush3.msra.mxu1 %v1586_v21 }
 0x12f   :  { %1184 = vmatprep.subr.mxu1 %v1448_v0 }
 0x130   :  { %1185 = vmatpush3.msra.mxu1 %v1592_v22 }
 0x131   :  { %1224 = vmatprep.subr.mxu1 %v1448_v0 }
 0x1d1   :  { %v237_v35 = vpop.f32.mrf.mxu1 }
 0x1d2   :  { %v241_v36 = vadd.f32 %v237_v35, %v154_v34 }
 0x1d3   :  { %v1118_v37 = vpop.f32.mrf.mxu1 }
 0x1d4   :  { %1342 = vtanh.f32 %v241_v36 }
 0x1e1   :  { %v1343_v39 = vpop.eup %1342 }
 0x1e2   :  { %v251_v40 = vsel %vm250_vm10, %v1343_v39, 0.0  ;;  %v254_v41 = vsel %vm250_vm10, %v1343_v39, %v150_v29 }
 0x1e3   :  { %253 = vst [vmem:[#allocation8 + $0x8] sm:$0xff] %v251_v40  ;;  %1152 = vmatmul.mubr.f32.vlgmr.msra.gmra.mxu0 %v254_v41 }
 0x1e4   :  { %1190 = vmatpush3.msra.mxu0 %v1498_v2  ;;  %1221 = vmatprep.mubr.msk.f32.mxu0 %vm1449_vm0, %v1448_v0 }
 0x1e5   :  { %1191 = vmatprep.subr.mxu0 %v1448_v0 }
 0x1e6   :  { %1192 = vmatpush3.msra.mxu0 %v1500_v3 }
 0x1e7   :  { %1193 = vmatprep.subr.mxu0 %v1448_v0 }
 0x1e8   :  { %1194 = vmatpush3.msra.mxu0 %v1505_v4 }
 0x1e9   :  { %1195 = vmatprep.subr.mxu0 %v1448_v0 }
 0x1ea   :  { %1196 = vmatpush3.msra.mxu0 %v1511_v5 }
 0x1eb   :  { %1197 = vmatprep.subr.mxu0 %v1448_v0 }
 0x1ec   :  { %1198 = vmatpush3.msra.mxu0 %v1522_v7 }
 0x1ed   :  { %1199 = vmatprep.subr.mxu0 %v1448_v0 }
 0x1ee   :  { %1200 = vmatpush3.msra.mxu0 %v1531_v9 }
 0x1ef   :  { %1201 = vmatprep.subr.mxu0 %v1448_v0 }
 0x1f0   :  { %1202 = vmatpush3.msra.mxu0 %v1537_v11 }
 0x1f1   :  { %1203 = vmatprep.subr.mxu0 %v1448_v0 }
 0x1f2   :  { %1204 = vmatpush3.msra.mxu0 %v1544_v12 }
 0x1f3   :  { %1205 = vmatprep.subr.mxu0 %v1448_v0 }
 0x1f4   :  { %1206 = vmatpush3.msra.mxu0 %v1550_v14 }
 0x1f5   :  { %1207 = vmatprep.subr.mxu0 %v1448_v0 }
 0x1f6   :  { %1208 = vmatpush3.msra.mxu0 %v1557_v15 }
 0x1f7   :  { %1209 = vmatprep.subr.mxu0 %v1448_v0 }
 0x1f8   :  { %1210 = vmatpush3.msra.mxu0 %v1563_v17 }
 0x1f9   :  { %1211 = vmatprep.subr.mxu0 %v1448_v0 }
 0x1fa   :  { %1212 = vmatpush3.msra.mxu0 %v1569_v18 }
 0x1fb   :  { %1213 = vmatprep.subr.mxu0 %v1448_v0 }
 0x1fc   :  { %1214 = vmatpush3.msra.mxu0 %v1574_v19 }
 0x1fd   :  { %1215 = vmatprep.subr.mxu0 %v1448_v0 }
 0x1fe   :  { %1216 = vmatpush3.msra.mxu0 %v1580_v20 }
 0x1ff   :  { %1217 = vmatprep.subr.mxu0 %v1448_v0 }
 0x200   :  { %1218 = vmatpush3.msra.mxu0 %v1586_v21 }
 0x201   :  { %1219 = vmatprep.subr.mxu0 %v1448_v0 }
 0x202   :  { %1220 = vmatpush3.msra.mxu0 %v1592_v22 }
 0x203   :  { %1259 = vmatprep.subr.mxu0 %v1448_v0 }
 0x2a3   :  { %v339_v43 = vpop.f32.mrf.mxu0 }
 0x2a4   :  { %v343_v44 = vadd.f32 %v339_v43, %v256_v42 }
 0x2a5   :  { %v1153_v45 = vpop.f32.mrf.mxu0 }
 0x2a6   :  { %1344 = vtanh.f32 %v343_v44 }
 0x2b3   :  { %v1345_v47 = vpop.eup %1344 }
 0x2b4   :  { %v353_v48 = vsel %vm352_vm11, %v1345_v47, 0.0  ;;  %v356_v49 = vsel %vm352_vm11, %v1345_v47, %v254_v41 }
 0x2b5   :  { %355 = vst [vmem:[#allocation8 + $0x10] sm:$0xff] %v353_v48  ;;  %1187 = vmatmul.mubr.f32.vlgmr.msra.gmra.mxu1 %v356_v49 }
 0x2b6   :  { %1225 = vmatpush3.msra.mxu1 %v1498_v2  ;;  %1256 = vmatprep.mubr.msk.f32.mxu1 %vm1449_vm0, %v1448_v0 }
 0x2b7   :  { %1226 = vmatprep.subr.mxu1 %v1448_v0 }
 0x2b8   :  { %1227 = vmatpush3.msra.mxu1 %v1500_v3 }
 0x2b9   :  { %1228 = vmatprep.subr.mxu1 %v1448_v0 }
 0x2ba   :  { %1229 = vmatpush3.msra.mxu1 %v1505_v4 }
 0x2bb   :  { %1230 = vmatprep.subr.mxu1 %v1448_v0 }
 0x2bc   :  { %1231 = vmatpush3.msra.mxu1 %v1511_v5 }
 0x2bd   :  { %1232 = vmatprep.subr.mxu1 %v1448_v0 }
 0x2be   :  { %1233 = vmatpush3.msra.mxu1 %v1522_v7 }
 0x2bf   :  { %1234 = vmatprep.subr.mxu1 %v1448_v0 }
 0x2c0   :  { %1235 = vmatpush3.msra.mxu1 %v1531_v9 }
 0x2c1   :  { %1236 = vmatprep.subr.mxu1 %v1448_v0 }
 0x2c2   :  { %1237 = vmatpush3.msra.mxu1 %v1537_v11 }
 0x2c3   :  { %1238 = vmatprep.subr.mxu1 %v1448_v0 }
 0x2c4   :  { %1239 = vmatpush3.msra.mxu1 %v1544_v12 }
 0x2c5   :  { %1240 = vmatprep.subr.mxu1 %v1448_v0 }
 0x2c6   :  { %1241 = vmatpush3.msra.mxu1 %v1550_v14 }
 0x2c7   :  { %1242 = vmatprep.subr.mxu1 %v1448_v0 }
 0x2c8   :  { %1243 = vmatpush3.msra.mxu1 %v1557_v15 }
 0x2c9   :  { %1244 = vmatprep.subr.mxu1 %v1448_v0 }
 0x2ca   :  { %1245 = vmatpush3.msra.mxu1 %v1563_v17 }
 0x2cb   :  { %1246 = vmatprep.subr.mxu1 %v1448_v0 }
 0x2cc   :  { %1247 = vmatpush3.msra.mxu1 %v1569_v18 }
 0x2cd   :  { %1248 = vmatprep.subr.mxu1 %v1448_v0 }
 0x2ce   :  { %1249 = vmatpush3.msra.mxu1 %v1574_v19 }
 0x2cf   :  { %1250 = vmatprep.subr.mxu1 %v1448_v0 }
 0x2d0   :  { %1251 = vmatpush3.msra.mxu1 %v1580_v20 }
 0x2d1   :  { %1252 = vmatprep.subr.mxu1 %v1448_v0 }
 0x2d2   :  { %1253 = vmatpush3.msra.mxu1 %v1586_v21 }
 0x2d3   :  { %1254 = vmatprep.subr.mxu1 %v1448_v0 }
 0x2d4   :  { %1255 = vmatpush3.msra.mxu1 %v1592_v22 }
 0x2d5   :  { %1294 = vmatprep.subr.mxu1 %v1448_v0 }
 0x375   :  { %v441_v51 = vpop.f32.mrf.mxu1 }
 0x376   :  { %v445_v52 = vadd.f32 %v441_v51, %v358_v50 }
 0x377   :  { %v1188_v53 = vpop.f32.mrf.mxu1 }
 0x378   :  { %1346 = vtanh.f32 %v445_v52 }
 0x385   :  { %v1347_v55 = vpop.eup %1346 }
 0x386   :  { %v455_v56 = vsel %vm454_vm12, %v1347_v55, 0.0  ;;  %v458_v57 = vsel %vm454_vm12, %v1347_v55, %v356_v49 }
 0x387   :  { %457 = vst [vmem:[#allocation8 + $0x18] sm:$0xff] %v455_v56  ;;  %1222 = vmatmul.mubr.f32.vlgmr.msra.gmra.mxu0 %v458_v57 }
 0x388   :  { %1260 = vmatpush3.msra.mxu0 %v1498_v2  ;;  %1291 = vmatprep.mubr.msk.f32.mxu0 %vm1449_vm0, %v1448_v0 }
 0x389   :  { %1261 = vmatprep.subr.mxu0 %v1448_v0 }
 0x38a   :  { %1262 = vmatpush3.msra.mxu0 %v1500_v3 }
 0x38b   :  { %1263 = vmatprep.subr.mxu0 %v1448_v0 }
 0x38c   :  { %1264 = vmatpush3.msra.mxu0 %v1505_v4 }
 0x38d   :  { %1265 = vmatprep.subr.mxu0 %v1448_v0 }
 0x38e   :  { %1266 = vmatpush3.msra.mxu0 %v1511_v5 }
 0x38f   :  { %1267 = vmatprep.subr.mxu0 %v1448_v0 }
 0x390   :  { %1268 = vmatpush3.msra.mxu0 %v1522_v7 }
 0x391   :  { %1269 = vmatprep.subr.mxu0 %v1448_v0 }
 0x392   :  { %1270 = vmatpush3.msra.mxu0 %v1531_v9 }
 0x393   :  { %1271 = vmatprep.subr.mxu0 %v1448_v0 }
 0x394   :  { %1272 = vmatpush3.msra.mxu0 %v1537_v11 }
 0x395   :  { %1273 = vmatprep.subr.mxu0 %v1448_v0 }
 0x396   :  { %1274 = vmatpush3.msra.mxu0 %v1544_v12 }
 0x397   :  { %1275 = vmatprep.subr.mxu0 %v1448_v0 }
 0x398   :  { %1276 = vmatpush3.msra.mxu0 %v1550_v14 }
 0x399   :  { %1277 = vmatprep.subr.mxu0 %v1448_v0 }
 0x39a   :  { %1278 = vmatpush3.msra.mxu0 %v1557_v15 }
 0x39b   :  { %1279 = vmatprep.subr.mxu0 %v1448_v0 }
 0x39c   :  { %1280 = vmatpush3.msra.mxu0 %v1563_v17 }
 0x39d   :  { %1281 = vmatprep.subr.mxu0 %v1448_v0 }
 0x39e   :  { %1282 = vmatpush3.msra.mxu0 %v1569_v18 }
 0x39f   :  { %1283 = vmatprep.subr.mxu0 %v1448_v0 }
 0x3a0   :  { %1284 = vmatpush3.msra.mxu0 %v1574_v19 }
 0x3a1   :  { %1285 = vmatprep.subr.mxu0 %v1448_v0 }
 0x3a2   :  { %1286 = vmatpush3.msra.mxu0 %v1580_v20 }
 0x3a3   :  { %1287 = vmatprep.subr.mxu0 %v1448_v0 }
 0x3a4   :  { %1288 = vmatpush3.msra.mxu0 %v1586_v21 }
 0x3a5   :  { %1289 = vmatprep.subr.mxu0 %v1448_v0 }
 0x3a6   :  { %1290 = vmatpush3.msra.mxu0 %v1592_v22 }
 0x447   :  { %v543_v59 = vpop.f32.mrf.mxu0 }
 0x448   :  { %v547_v60 = vadd.f32 %v543_v59, %v460_v58 }
 0x449   :  { %v1223_v61 = vpop.f32.mrf.mxu0 }
 0x44a   :  { %1348 = vtanh.f32 %v547_v60 }
 0x457   :  { %v1349_v63 = vpop.eup %1348 }
 0x458   :  { %v557_v1 = vsel %vm556_vm13, %v1349_v63, 0.0  ;;  %v560_v6 = vsel %vm556_vm13, %v1349_v63, %v458_v57 }
 0x459   :  { %559 = vst [vmem:[#allocation8 + $0x20] sm:$0xff] %v557_v1  ;;  %1257 = vmatmul.mubr.f32.vlgmr.msra.gmra.mxu1 %v560_v6 }
 0x45a   :  { %1295 = vmatpush3.msra.mxu1 %v1498_v2  ;;  %1326 = vmatprep.mubr.msk.f32.mxu1 %vm1449_vm0, %v1448_v0  ;;  %v562_v2 = vld [vmem:[#allocation3 + $0x28] sm:$0xff] }
 0x45b   :  { %1296 = vmatprep.subr.mxu1 %v1448_v0 }
 0x45c   :  { %1297 = vmatpush3.msra.mxu1 %v1500_v3 }
 0x45d   :  { %1298 = vmatprep.subr.mxu1 %v1448_v0 }
 0x45e   :  { %1299 = vmatpush3.msra.mxu1 %v1505_v4 }
 0x45f   :  { %1300 = vmatprep.subr.mxu1 %v1448_v0 }
 0x460   :  { %1301 = vmatpush3.msra.mxu1 %v1511_v5 }
 0x461   :  { %1302 = vmatprep.subr.mxu1 %v1448_v0 }
 0x462   :  { %1303 = vmatpush3.msra.mxu1 %v1522_v7  ;;  %v657_v7 = vpop.permute.xlu1 %656 }
 0x463   :  { %1304 = vmatprep.subr.mxu1 %v1448_v0  ;;  %vm658_vm14 = vcmp.eq.s32.totalorder %v657_v7, 1 }
 0x464   :  { %1305 = vmatpush3.msra.mxu1 %v1531_v9 }
 0x465   :  { %1306 = vmatprep.subr.mxu1 %v1448_v0 }
 0x466   :  { %1307 = vmatpush3.msra.mxu1 %v1537_v11  ;;  %v664_v11 = vld [vmem:[#allocation3 + $0x30] sm:$0xff] }
 0x467   :  { %1308 = vmatprep.subr.mxu1 %v1448_v0 }
 0x468   :  { %1309 = vmatpush3.msra.mxu1 %v1544_v12 }
 0x469   :  { %1310 = vmatprep.subr.mxu1 %v1448_v0 }
 0x46a   :  { %1311 = vmatpush3.msra.mxu1 %v1550_v14 }
 0x46b   :  { %1312 = vmatprep.subr.mxu1 %v1448_v0 }
 0x46c   :  { %1313 = vmatpush3.msra.mxu1 %v1557_v15 }
 0x46d   :  { %1314 = vmatprep.subr.mxu1 %v1448_v0 }
 0x46e   :  { %1315 = vmatpush3.msra.mxu1 %v1563_v17 }
 0x46f   :  { %1316 = vmatprep.subr.mxu1 %v1448_v0 }
 0x470   :  { %1317 = vmatpush3.msra.mxu1 %v1569_v18  ;;  %v766_v18 = vld [vmem:[#allocation3 + $0x38] sm:$0xff] }
 0x471   :  { %1318 = vmatprep.subr.mxu1 %v1448_v0 }
 0x472   :  { %1319 = vmatpush3.msra.mxu1 %v1574_v19 }
 0x473   :  { %1320 = vmatprep.subr.mxu1 %v1448_v0 }
 0x474   :  { %1321 = vmatpush3.msra.mxu1 %v1580_v20 }
 0x475   :  { %1322 = vmatprep.subr.mxu1 %v1448_v0 }
 0x476   :  { %1323 = vmatpush3.msra.mxu1 %v1586_v21 }
 0x477   :  { %1324 = vmatprep.subr.mxu1 %v1448_v0  ;;  %v759_v0 = vpop.permute.xlu0 %758 }
 0x478   :  { %1325 = vmatpush3.msra.mxu1 %v1592_v22  ;;  %vm760_vm15 = vcmp.eq.s32.totalorder %v759_v0, 1  ;;  %v861_v22 = vpop.permute.xlu1 %860 }
 0x479   :  { %vm862_vm0 = vcmp.eq.s32.totalorder %v861_v22, 1 }
 0x519   :  { %v645_v3 = vpop.f32.mrf.mxu1 }
 0x51a   :  { %v649_v4 = vadd.f32 %v645_v3, %v562_v2 }
 0x51b   :  { %v1258_v5 = vpop.f32.mrf.mxu1 }
 0x51c   :  { %1350 = vtanh.f32 %v649_v4 }
 0x529   :  { %v1351_v8 = vpop.eup %1350 }
 0x52a   :  { %v659_v9 = vsel %vm658_vm14, %v1351_v8, 0.0  ;;  %v662_v10 = vsel %vm658_vm14, %v1351_v8, %v560_v6 }
 0x52b   :  { %661 = vst [vmem:[#allocation8 + $0x28] sm:$0xff] %v659_v9  ;;  %1292 = vmatmul.mubr.f32.vlgmr.msra.gmra.mxu0 %v662_v10 }
 0x5eb   :  { %v747_v12 = vpop.f32.mrf.mxu0 }
 0x5ec   :  { %v751_v13 = vadd.f32 %v747_v12, %v664_v11 }
 0x5ed   :  { %v1293_v14 = vpop.f32.mrf.mxu0 }
 0x5ee   :  { %1352 = vtanh.f32 %v751_v13 }
 0x5fb   :  { %v1353_v15 = vpop.eup %1352 }
 0x5fc   :  { %v761_v16 = vsel %vm760_vm15, %v1353_v15, 0.0  ;;  %v764_v17 = vsel %vm760_vm15, %v1353_v15, %v662_v10 }
 0x5fd   :  { %763 = vst [vmem:[#allocation8 + $0x30] sm:$0xff] %v761_v16  ;;  %1327 = vmatmul.mubr.f32.vlgmr.msra.gmra.mxu1 %v764_v17 }
 0x6bd   :  { %v849_v19 = vpop.f32.mrf.mxu1 }
 0x6be   :  { %v853_v20 = vadd.f32 %v849_v19, %v766_v18 }
 0x6bf   :  { %v1328_v21 = vpop.f32.mrf.mxu1 }
 0x6c0   :  { %1354 = vtanh.f32 %v853_v20 }
 0x6cd   :  { %v1355_v23 = vpop.eup %1354 }
 0x6ce   :  { %v863_v24 = vsel %vm862_vm0, %v1355_v23, 0.0  ;;  %v866_v25 = vsel %vm862_vm0, %v1355_v23, %v764_v17 }
 0x6cf   :  { %865 = vst [vmem:[#allocation8 + $0x38] sm:$0xff] %v863_v24  ;;  %871 = vst [vmem:[#allocation9] sm:$0xff] %v866_v25 }
 0x6d0   :  { %1407 = shalt.err (!%p1404_p0)
}
 0x6d1   :  { %883 = dma.vmem_to_hbm [thread:$0]  %s878_s27, 1024, %s1830_s3, [#allocation5], %s1445_s18, %s1445_s18, %s1446_s19  }
 0x6d2   :  { %s1416_s7 = scalar_lea.vmem %s891_s29, 128  ;;  %p1421_p2 = scmp.lt.s32.totalorder %s891_s29, %s891_s29 }
 0x6d3   :  { %p1417_p1 = scmp.ne.s32.totalorder %s891_s29, %s1416_s7  ;;  %p1422_p3 = scmp.lt.s32.totalorder %s1416_s7, %s1416_s7 }
 0x6d5   :  { %p1423_p4 = por %p1422_p3, %p1421_p2 }
 0x6d7   :  { %p1424_p5 = pnand %p1423_p4, %p1417_p1 }
 0x6d9   :  { %1427 = shalt.err (!%p1424_p5)
}
 0x6da   :  { %893 = dma.vmem_to_hbm [thread:$0]  %s891_s29, 128, %s1831_s4, [#allocation10]  }
 0x6db   :  { %1440 = dma.done.wait [#allocation5], 1024  }
 0x6dc   :  { %1441 = vsyncadd [#allocation5], 4294966272 }
 0x6dd   :  { %1442 = dma.done.wait [#allocation10], 128  }
 0x6de   :  { %1443 = vsyncadd [#allocation10], 4294967168 }
 0x6df   :  { %900 = vsyncpa [#allocation4], 1 }
 0x6e0   :  { %901 = vsyncpa [#allocation7], 1 }
 0x6e1   :  { %902 = vsyncpa [#allocation5], 1 }
 0x6e2   :  { %903 = vsyncpa [#allocation10], 1 }

</bundles_post_ra>
